<compile_context>
chip_gen: v5e
topology: v5e:2x2
jax: 0.10.0
libtpu: 0.0.40
codegen_flags: <defaults>
</compile_context>

<pallas_src>
import functools

import numpy as np
import jax
import jax.numpy as jnp
from jax import lax
from jax.experimental import pallas as pl
from jax.experimental.pallas import tpu as pltpu

_LANES = 128
_SUBLANES = 8


# ----------------------------------------------------------------------------
# Shared helpers
# ----------------------------------------------------------------------------
def _reference(t: jax.Array, tdim: int = 4) -> jax.Array:
    tt = t[..., None]
    return jnp.concatenate([tt ** k for k in range(1, tdim + 1)], axis=-1)


def _sublane_multiple(dtype) -> int:
    # Sub-32-bit dtypes pack along sublanes: 8 rows for 4B, 16 for 2B, 32 for 1B.
    return max(_SUBLANES, 32 // jnp.dtype(dtype).itemsize)


def _pick_block_rows(rows: int, sub: int, cap_rows: int) -> int:
    """Row-block size: capped tile, even (>=2) grid steps for non-tiny inputs."""
    cap = max(sub, (cap_rows // sub) * sub)
    steps = 2 * int(pl.cdiv(rows, 2 * cap))          # even number of steps
    block = int(pl.cdiv(rows, steps))
    block = ((block + sub - 1) // sub) * sub         # dtype-aware sublane rounding
    return max(1, min(block, cap, rows))


def _vmem_limit(in_block_bytes: int, out_block_bytes: int) -> int:
    # double-buffered pipeline buffers + compiler temporaries + headroom,
    # clamped so we never ask for more than half of v7x's 64 MiB physical VMEM.
    need = 2 * (in_block_bytes + out_block_bytes) + 6 * out_block_bytes + (4 << 20)
    return int(min(32 << 20, max(8 << 20, need)))


def _flatten_pad_to_lanes(t: jax.Array):
    """Flatten and pad only to the 128-lane boundary (<=127 extra elements)."""
    flat = t.reshape(-1)
    n = flat.shape[0]
    rows = int(pl.cdiv(n, _LANES))
    n_pad = rows * _LANES
    if n_pad != n:
        flat = jnp.pad(flat, (0, n_pad - n))
    return flat.reshape(rows, _LANES), n, n_pad, rows


# ----------------------------------------------------------------------------
# Primary path: lane-interleaved output (final layout written by the kernel)
# ----------------------------------------------------------------------------
def _poly_interleave_kernel(src_ref, phase_ref, t_ref, o_ref, *, tdim: int):
    # t_ref: (bm, 128).  o_ref: (bm, 128*tdim); lane j*tdim + k = t[:, j]**(k+1).
    t = t_ref[...]
    bm = t.shape[0]
    lanes = o_ref.shape[-1]

    # Every 128-lane window of tt is a full copy of t (period 128), so the gather
    # below stays within a single source vreg per output vreg.
    tt = jnp.concatenate([t] * tdim, axis=-1) if tdim > 1 else t      # (bm, lanes)

    # Constant fan-out indices / power phase, precomputed on the host and
    # broadcast along sublanes (cheap).
    src = jnp.broadcast_to(src_ref[...], (bm, lanes))                  # int32
    phase = jnp.broadcast_to(phase_ref[...], (bm, lanes))              # int32

    rep = jnp.take_along_axis(tt, src, axis=-1, mode="promise_in_bounds")

    # out[:, m] = rep[:, m] ** (phase[m] + 1), built with cumulative multiplies.
    out = rep
    p = rep
    for i in range(1, tdim):                                           # tdim is small & static
        p = p * rep
        out = jnp.where(phase >= i, p, out)

    o_ref[...] = out.astype(o_ref.dtype)                               # full-width lane-dense store


def _poly_embed_interleaved(t: jax.Array, tdim: int) -> jax.Array:
    orig_shape = t.shape
    dtype = t.dtype
    tmat, n, n_pad, rows = _flatten_pad_to_lanes(t)

    itemsize = jnp.dtype(dtype).itemsize
    sub = _sublane_multiple(dtype)
    block_rows = _pick_block_rows(rows, sub, cap_rows=512)
    grid = (int(pl.cdiv(rows, block_rows)),)
    lanes = _LANES * tdim

    # Host-side constant index tables: output lane m -> source lane / power index.
    m = np.arange(lanes, dtype=np.int32)
    src_idx = jnp.asarray((m // tdim + _LANES * (m // _LANES)).reshape(1, lanes))
    phase = jnp.asarray((m % tdim).reshape(1, lanes))

    in_bytes = block_rows * _LANES * itemsize
    out_bytes = block_rows * lanes * itemsize
    cost = pl.CostEstimate(flops=(tdim - 1) * n_pad, transcendentals=0,
                           bytes_accessed=(1 + tdim) * n_pad * itemsize)

    out = pl.pallas_call(
        functools.partial(_poly_interleave_kernel, tdim=tdim),
        out_shape=jax.ShapeDtypeStruct((rows, lanes), dtype),
        grid_spec=pltpu.PrefetchScalarGridSpec(
            num_scalar_prefetch=0,
            grid=grid,
            in_specs=[
                pl.BlockSpec((1, lanes), lambda i: (0, 0)),      # src_idx (resident)
                pl.BlockSpec((1, lanes), lambda i: (0, 0)),      # phase   (resident)
                pl.BlockSpec((block_rows, _LANES), lambda i: (i, 0)),
            ],
            out_specs=pl.BlockSpec((block_rows, lanes), lambda i: (i, 0)),
        ),
        compiler_params=pltpu.CompilerParams(
            dimension_semantics=("parallel",),
            vmem_limit_bytes=_vmem_limit(in_bytes, out_bytes),
        ),
        cost_estimate=cost,
    )(src_idx, phase, tmat)

    # Pure reshape (the slab IS the final element-major layout); slice only if padded.
    out = out.reshape(n_pad, tdim)
    if n_pad != n:
        out = out[:n]
    return out.reshape(orig_shape + (tdim,))


# ----------------------------------------------------------------------------
# Fallback path: tdim-major slab kernel + wrapper transpose (proven to lower)
# ----------------------------------------------------------------------------
def _poly_slab_kernel(t_ref, o_ref, *, tdim: int):
    # t_ref: (block_rows, 128); o_ref: (tdim, block_rows, 128); plane k = t**(k+1).
    t = t_ref[...]
    p = t
    o_ref[0] = p
    for k in range(1, tdim):
        p = p * t
        o_ref[k] = p


def _poly_embed_slab(t: jax.Array, tdim: int) -> jax.Array:
    orig_shape = t.shape
    dtype = t.dtype
    tmat, n, n_pad, rows = _flatten_pad_to_lanes(t)

    itemsize = jnp.dtype(dtype).itemsize
    sub = _sublane_multiple(dtype)
    block_rows = _pick_block_rows(rows, sub, cap_rows=1024)
    grid = (int(pl.cdiv(rows, block_rows)),)

    in_bytes = block_rows * _LANES * itemsize
    out_bytes = tdim * block_rows * _LANES * itemsize
    cost = pl.CostEstimate(flops=(tdim - 1) * n_pad, transcendentals=0,
                           bytes_accessed=(1 + tdim) * n_pad * itemsize)

    out = pl.pallas_call(
        functools.partial(_poly_slab_kernel, tdim=tdim),
        out_shape=jax.ShapeDtypeStruct((tdim, rows, _LANES), dtype),
        grid_spec=pltpu.PrefetchScalarGridSpec(
            num_scalar_prefetch=0,
            grid=grid,
            in_specs=[pl.BlockSpec((block_rows, _LANES), lambda i: (i, 0))],
            out_specs=pl.BlockSpec((tdim, block_rows, _LANES), lambda i: (0, i, 0)),
        ),
        compiler_params=pltpu.CompilerParams(
            dimension_semantics=("parallel",),
            vmem_limit_bytes=_vmem_limit(in_bytes, out_bytes),
        ),
        cost_estimate=cost,
    )(tmat)

    out = out.reshape(tdim, n_pad)
    if n_pad != n:
        out = out[:, :n]
    out = jnp.moveaxis(out, 0, -1)            # layout plumbing (fallback path only)
    return out.reshape(orig_shape + (tdim,))


# ----------------------------------------------------------------------------
# Public entry point with a one-time capability probe
# ----------------------------------------------------------------------------
_INTERLEAVE_OK = {}


def _interleave_supported(tdim: int, dtype) -> bool:
    key = (int(tdim), jnp.dtype(dtype).name)
    if key not in _INTERLEAVE_OK:
        try:
            n = 2 * _SUBLANES * _LANES                     # 2048 elems -> 2 grid steps
            x = ((jnp.arange(n, dtype=jnp.float32) % 13) - 6.0) / 7.0
            x = x.astype(dtype)
            got = jax.block_until_ready(_poly_embed_interleaved(x, tdim))
            want = _reference(x, tdim)
            tol = 1e-6 if jnp.dtype(dtype).itemsize >= 4 else 2e-2
            ok = bool(jnp.allclose(got, want, rtol=tol, atol=tol))
        except Exception:                                  # lowering not supported -> fallback
            ok = False
        _INTERLEAVE_OK[key] = ok
    return _INTERLEAVE_OK[key]


def polynomial_embedding(t: jax.Array, tdim: int = 4) -> jax.Array:
    """Pallas equivalent of PolynomialEmbedding(tdim).forward(t): (...,) -> (..., tdim)."""
    if t.size == 0:                                        # review: guard the n == 0 edge case
        return jnp.zeros(t.shape + (tdim,), dtype=t.dtype)
    # TODO(synk): best option is to fuse this embedding into its consumer (e.g. a
    # Linear(tdim, H)) so the tdim-expanded tensor never round-trips HBM; not
    # applicable to the standalone module.
    if _interleave_supported(tdim, t.dtype):
        return _poly_embed_interleaved(t, tdim)
    return _poly_embed_slab(t, tdim)


# ----------------------------------------------------------------------------
# Self-test
# ----------------------------------------------------------------------------
if __name__ == "__main__":
    tdim = 4

    # Small example consistent with a "time" tensor: batch=2, seq=16 time values.
    t = jax.random.uniform(jax.random.PRNGKey(0), (2, 16), dtype=jnp.float32,
                           minval=-1.0, maxval=1.0)
    out = jax.block_until_ready(polynomial_embedding(t, tdim=tdim))
    ref = _reference(t, tdim=tdim)
    assert out.shape == (2, 16, tdim), out.shape
    assert jnp.allclose(out, ref, atol=1e-5, rtol=1e-5), "mismatch vs reference"

    # Unaligned-size check (exercises lane padding + ragged last-block path).
    t2 = jax.random.uniform(jax.random.PRNGKey(1), (3, 50), dtype=jnp.float32,
                            minval=-2.0, maxval=2.0)
    out2 = jax.block_until_ready(polynomial_embedding(t2, tdim=tdim))
    ref2 = _reference(t2, tdim=tdim)
    assert out2.shape == (3, 50, tdim), out2.shape
    assert jnp.allclose(out2, ref2, atol=1e-5, rtol=1e-5), "mismatch vs reference (unaligned)"

    # Empty-input edge case (review correctness concern).
    t0 = jnp.zeros((0, 7), dtype=jnp.float32)
    out0 = polynomial_embedding(t0, tdim=tdim)
    assert out0.shape == (0, 7, tdim), out0.shape

    print("KERNEL_OK")
</pallas_src>

<mosaic_0001>
module attributes {stable_mosaic.version = 11 : i64} {
  func.func @_poly_interleave_kernel(%arg0: i32, %arg1: memref<1x512xi32, #tpu.memory_space<vmem>>, %arg2: memref<1x512xi32, #tpu.memory_space<vmem>>, %arg3: memref<8x128xf32, #tpu.memory_space<vmem>>, %arg4: memref<8x512xf32, #tpu.memory_space<vmem>>) attributes {dimension_semantics = [#tpu.dimension_semantics<parallel>], iteration_bounds = array<i64: 2>, scalar_prefetch = 0 : i64, scratch_operands = 0 : i64, tpu.core_type = #tpu.core_type<tc>, window_params = [{pipeline_mode = #tpu.pipeline_mode<synchronous>, transform_indices = @transform_0, window_bounds = array<i64: 1, 512>}, {pipeline_mode = #tpu.pipeline_mode<synchronous>, transform_indices = @transform_1, window_bounds = array<i64: 1, 512>}, {transform_indices = @transform_2, window_bounds = array<i64: 8, 128>}, {transform_indices = @transform_3, window_bounds = array<i64: 8, 512>}]} {
    %c0 = arith.constant 0 : index
    %c0_0 = arith.constant 0 : index
    %0 = vector.load %arg3[%c0, %c0_0] : memref<8x128xf32, #tpu.memory_space<vmem>>, vector<8x128xf32>
    %1 = tpu.concatenate %0, %0, %0, %0 in 1 : vector<8x128xf32>, vector<8x128xf32>, vector<8x128xf32>, vector<8x128xf32> -> vector<8x512xf32>
    %c0_1 = arith.constant 0 : index
    %c0_2 = arith.constant 0 : index
    %2 = vector.load %arg1[%c0_1, %c0_2] : memref<1x512xi32, #tpu.memory_space<vmem>>, vector<1x512xi32>
    %3 = vector.shape_cast %2 : vector<1x512xi32> to vector<1x512xi32>
    %4 = vector.broadcast %3 : vector<1x512xi32> to vector<8x512xi32>
    %c0_3 = arith.constant 0 : index
    %c0_4 = arith.constant 0 : index
    %5 = vector.load %arg2[%c0_3, %c0_4] : memref<1x512xi32, #tpu.memory_space<vmem>>, vector<1x512xi32>
    %6 = vector.shape_cast %5 : vector<1x512xi32> to vector<1x512xi32>
    %7 = vector.broadcast %6 : vector<1x512xi32> to vector<8x512xi32>
    %8 = vector.shape_cast %4 : vector<8x512xi32> to vector<8x512x1xi32>
    %9 = vector.shape_cast %8 : vector<8x512x1xi32> to vector<8x512xi32>
    %10 = tpu.dynamic_gather %1[%9] in [1] : vector<8x512xf32>, vector<8x512xi32> -> vector<8x512xf32>
    %11 = arith.mulf %10, %10 : vector<8x512xf32>
    %c1_i32 = arith.constant 1 : i32
    %12 = vector.broadcast %c1_i32 : i32 to vector<8x512xi32>
    %13 = arith.cmpi sge, %7, %12 : vector<8x512xi32>
    %14 = arith.select %13, %11, %10 : vector<8x512xi1>, vector<8x512xf32>
    %15 = arith.mulf %11, %10 : vector<8x512xf32>
    %c2_i32 = arith.constant 2 : i32
    %16 = vector.broadcast %c2_i32 : i32 to vector<8x512xi32>
    %17 = arith.cmpi sge, %7, %16 : vector<8x512xi32>
    %18 = arith.select %17, %15, %14 : vector<8x512xi1>, vector<8x512xf32>
    %19 = arith.mulf %15, %10 : vector<8x512xf32>
    %c3_i32 = arith.constant 3 : i32
    %20 = vector.broadcast %c3_i32 : i32 to vector<8x512xi32>
    %21 = arith.cmpi sge, %7, %20 : vector<8x512xi32>
    %22 = arith.select %21, %19, %18 : vector<8x512xi1>, vector<8x512xf32>
    %c0_5 = arith.constant 0 : index
    %c0_6 = arith.constant 0 : index
    %23 = vector.load %arg4[%c0_5, %c0_6] : memref<8x512xf32, #tpu.memory_space<vmem>>, vector<8x512xf32>
    tpu.vector_store %arg4[%c0_5, %c0_6], %22 {strides = array<i32>} : memref<8x512xf32, #tpu.memory_space<vmem>>, vector<8x512xf32>,
    return
  }
  func.func @transform_0(%arg0: i32) -> (i32, i32) {
    %c0_i32 = arith.constant 0 : i32
    %c0_i32_0 = arith.constant 0 : i32
    %c0_i32_1 = arith.constant 0 : i32
    return %c0_i32, %c0_i32_0 : i32, i32
  }
  func.func @transform_1(%arg0: i32) -> (i32, i32) {
    %c0_i32 = arith.constant 0 : i32
    %c0_i32_0 = arith.constant 0 : i32
    %c0_i32_1 = arith.constant 0 : i32
    return %c0_i32, %c0_i32_0 : i32, i32
  }
  func.func @transform_2(%arg0: i32) -> (i32, i32) {
    %c0_i32 = arith.constant 0 : i32
    %c0_i32_0 = arith.constant 0 : i32
    return %arg0, %c0_i32 : i32, i32
  }
  func.func @transform_3(%arg0: i32) -> (i32, i32) {
    %c0_i32 = arith.constant 0 : i32
    %c0_i32_0 = arith.constant 0 : i32
    return %arg0, %c0_i32 : i32, i32
  }
}

module attributes {stable_mosaic.version = 11 : i64} {
  func.func @_poly_slab_kernel(%arg0: i32, %arg1: memref<1x128xf32, #tpu.memory_space<vmem>>, %arg2: memref<4x1x128xf32, #tpu.memory_space<vmem>>) attributes {dimension_semantics = [#tpu.dimension_semantics<parallel>], iteration_bounds = array<i64: 1>, scalar_prefetch = 0 : i64, scratch_operands = 0 : i64, tpu.core_type = #tpu.core_type<tc>, window_params = [{transform_indices = @transform_0, window_bounds = array<i64: 1, 128>}, {transform_indices = @transform_1, window_bounds = array<i64: 4, 1, 128>}]} {
    %c0 = arith.constant 0 : index
    %c0_0 = arith.constant 0 : index
    %0 = vector.load %arg1[%c0, %c0_0] : memref<1x128xf32, #tpu.memory_space<vmem>>, vector<1x128xf32>
    %c0_1 = arith.constant 0 : index
    %c0_2 = arith.constant 0 : index
    %c0_3 = arith.constant 0 : index
    %1 = vector.load %arg2[%c0_1, %c0_2, %c0_3] : memref<4x1x128xf32, #tpu.memory_space<vmem>>, vector<1x1x128xf32>
    %2 = vector.shape_cast %1 : vector<1x1x128xf32> to vector<1x128xf32>
    %3 = vector.shape_cast %0 : vector<1x128xf32> to vector<1x1x128xf32>
    tpu.vector_store %arg2[%c0_1, %c0_2, %c0_3], %3 {strides = array<i32>} : memref<4x1x128xf32, #tpu.memory_space<vmem>>, vector<1x1x128xf32>,
    %4 = arith.mulf %0, %0 : vector<1x128xf32>
    %c1 = arith.constant 1 : index
    %c0_4 = arith.constant 0 : index
    %c0_5 = arith.constant 0 : index
    %5 = vector.load %arg2[%c1, %c0_4, %c0_5] : memref<4x1x128xf32, #tpu.memory_space<vmem>>, vector<1x1x128xf32>
    %6 = vector.shape_cast %5 : vector<1x1x128xf32> to vector<1x128xf32>
    %7 = vector.shape_cast %4 : vector<1x128xf32> to vector<1x1x128xf32>
    tpu.vector_store %arg2[%c1, %c0_4, %c0_5], %7 {strides = array<i32>} : memref<4x1x128xf32, #tpu.memory_space<vmem>>, vector<1x1x128xf32>,
    %8 = arith.mulf %4, %0 : vector<1x128xf32>
    %c2 = arith.constant 2 : index
    %c0_6 = arith.constant 0 : index
    %c0_7 = arith.constant 0 : index
    %9 = vector.load %arg2[%c2, %c0_6, %c0_7] : memref<4x1x128xf32, #tpu.memory_space<vmem>>, vector<1x1x128xf32>
    %10 = vector.shape_cast %9 : vector<1x1x128xf32> to vector<1x128xf32>
    %11 = vector.shape_cast %8 : vector<1x128xf32> to vector<1x1x128xf32>
    tpu.vector_store %arg2[%c2, %c0_6, %c0_7], %11 {strides = array<i32>} : memref<4x1x128xf32, #tpu.memory_space<vmem>>, vector<1x1x128xf32>,
    %12 = arith.mulf %8, %0 : vector<1x128xf32>
    %c3 = arith.constant 3 : index
    %c0_8 = arith.constant 0 : index
    %c0_9 = arith.constant 0 : index
    %13 = vector.load %arg2[%c3, %c0_8, %c0_9] : memref<4x1x128xf32, #tpu.memory_space<vmem>>, vector<1x1x128xf32>
    %14 = vector.shape_cast %13 : vector<1x1x128xf32> to vector<1x128xf32>
    %15 = vector.shape_cast %12 : vector<1x128xf32> to vector<1x1x128xf32>
    tpu.vector_store %arg2[%c3, %c0_8, %c0_9], %15 {strides = array<i32>} : memref<4x1x128xf32, #tpu.memory_space<vmem>>, vector<1x1x128xf32>,
    return
  }
  func.func @transform_0(%arg0: i32) -> (i32, i32) {
    %c0_i32 = arith.constant 0 : i32
    %c0_i32_0 = arith.constant 0 : i32
    return %arg0, %c0_i32 : i32, i32
  }
  func.func @transform_1(%arg0: i32) -> (i32, i32, i32) {
    %c0_i32 = arith.constant 0 : i32
    %c0_i32_0 = arith.constant 0 : i32
    %c0_i32_1 = arith.constant 0 : i32
    return %c0_i32, %arg0, %c0_i32_0 : i32, i32, i32
  }
}

</mosaic_0001>

<bundles_post_ra>
// kernel: tpu_custom_call.1
= control target key start
LH: loop header
LB: loop body
LE: loop exit
PB: predicated region body
PF: predicated region fallthrough
CT: control target
= control target key end

     0   :  { %6 = vsyncpa [#allocation3], 0  ;;  %s129_s0 = inlined_call_operand.hbm [shape: f32[1,128], index: 0, kind: input, shape index: {}]   ;;  %s130_s1 = inlined_call_operand.hbm [shape: f32[4,1,128], index: 1, kind: output, shape index: {}]  }
   0x1   :  { %7 = vsyncpa [#allocation4], 0  ;;  %s13_s8 = sshll.u32 %s129_s0, 4  ;;  %s109_s9 = smov [#allocation2]   ;;  %s14_s8 = int_to_ptr.hbm [resolvable:$true] %s13_s8 }
   0x2   :  { %s15_s10 = sshll.u32 %s109_s9, 4  ;;  %s16_s10 = int_to_ptr.vmem [resolvable:$true] %s15_s10 }
   0x3   :  { %18 = dma.hbm_to_vmem [thread:$0]  %s14_s8, 16, %s16_s10, [#allocation3]  }
   0x4   :  { %105 = dma.done.wait [#allocation3], 16  }
   0x5   :  { %106 = vsyncadd [#allocation3], 4294967280  ;;  %v23_v0 = vld [vmem:[#allocation2] sm:$0x1]  ;;  %s110_s11 = smov [#allocation5]   ;;  %s40_s15 = sshll.u32 %s130_s1, 4  ;;  %s41_s15 = int_to_ptr.hbm [resolvable:$true] %s40_s15 }
   0x6   :  { %24 = vst [vmem:[#allocation5] sm:$0x1] %v23_v0  ;;  %v25_v1 = vmul.f32 %v23_v0, %v23_v0  ;;  %s38_s12 = sshll.u32 %s110_s11, 4  ;;  %s111_s0 = smov 16   ;;  %s39_s12 = int_to_ptr.vmem [resolvable:$true] %s38_s12 }
   0x7   :  { %s112_s16 = smov 1  }
   0x8   :  { %27 = vst [vmem:[#allocation5 + $0x1] sm:$0x1] %v25_v1  ;;  %v28_v2 = vmul.f32 %v25_v1, %v23_v0 }
   0xa   :  { %30 = vst [vmem:[#allocation5 + $0x2] sm:$0x1] %v28_v2  ;;  %v31_v3 = vmul.f32 %v28_v2, %v23_v0 }
   0xc   :  { %33 = vst [vmem:[#allocation5 + $0x3] sm:$0x1] %v31_v3 }
   0xd   :  { %46 = dma.vmem_to_hbm [thread:$0]  %s39_s12, 64, %s41_s15, [#allocation4], %s111_s0, %s111_s0, %s112_s16  }
   0xe   :  { %107 = dma.done.wait [#allocation4], 64  }
   0xf   :  { %108 = vsyncadd [#allocation4], 4294967232 }
  0x10   :  { %51 = vsyncpa [#allocation3], 1 }
  0x11   :  { %52 = vsyncpa [#allocation4], 1 }

</bundles_post_ra>
